<compile_context>
chip_gen: v7x
topology: tpu7x:2x2x1
jax: 0.10.0
libtpu: 0.0.40
codegen_flags: <defaults>
</compile_context>

<pallas_src>
import functools
import math

import jax
import jax.numpy as jnp
from jax import lax
from jax.experimental import pallas as pl
from jax.experimental.pallas import tpu as pltpu

_INV_SQRT2 = 1.0 / math.sqrt(2.0)


def _round_up(x, m):
    return ((x + m - 1) // m) * m


def _cdiv(a, b):
    return (a + b - 1) // b


def _has_native_bf16_vpu():
    """True on TPU generations with a native bf16 VPU (v6e / v7x); False otherwise."""
    try:
        kind = jax.devices()[0].device_kind.lower()
    except Exception:
        return False
    if "tpu" not in kind:
        return False
    return not any(v in kind for v in ("v2", "v3", "v4", "v5"))


def _mlp_kernel(x_ref, w1_ref, b1_ref, w2_ref, b2_ref, o_ref, *, gelu_bf16):
    # x_ref:  (TILE_B, IN)   row-major batch block straight from HBM
    # w1_ref: (H, IN)        b1_ref: (H, 1)
    # w2_ref: (H, OUT)       b2_ref: (1, OUT)
    # o_ref:  (TILE_B, OUT)  row-major batch block
    x = x_ref[...]

    # h^T[h, b] = sum_i W1t[h, i] * x[b, i]  -> (H, TILE_B): batch on lanes so the
    # elementwise GELU below uses fully dense vregs (hidden=64 would only fill
    # half a vreg on the lane axis). The transposed contraction runs on the
    # otherwise-idle MXU ("NT" dot), not via a VMEM transpose.
    h = lax.dot_general(
        w1_ref[...], x, (((1,), (1,)), ((), ())),
        preferred_element_type=jnp.float32,
    ) + b1_ref[...]

    # Exact GELU (PyTorch nn.GELU default): 0.5 * h * (1 + erf(h / sqrt(2))).
    # This is the VALU-bound steady-state bottleneck; on v6e/v7x it can run in
    # bf16 (2x packed VPU throughput, halved VMEM for h/g); v5e stays f32.
    if gelu_bf16:
        hb = h.astype(jnp.bfloat16)
        g = (0.5 * hb * (1.0 + lax.erf(hb * _INV_SQRT2))).astype(jnp.float32)
    else:
        g = 0.5 * h * (1.0 + lax.erf(h * _INV_SQRT2))

    # out[b, o] = sum_h g[h, b] * W2[h, o]  -> (TILE_B, OUT): already the
    # row-major output layout, so no wrapper-side transpose of the result ("TN" dot).
    out = lax.dot_general(
        g, w2_ref[...], (((0,), (0,)), ((), ())),
        preferred_element_type=jnp.float32,
    ) + b2_ref[...]
    o_ref[...] = out.astype(o_ref.dtype)


def simple_nn_discrete_forward(x, w1, b1, w2, b2, d, *, max_tile_b=8192, gelu_bf16=None):
    """x: (B, k*d+1) f32. w1: (IN, H), b1: (H,), w2: (H, OUT), b2: (OUT,).

    Returns (B, d, output_classes), matching the PyTorch module's .view.

    gelu_bf16: False -> exact f32 erf-GELU (nn.GELU semantics);
               True  -> bf16 GELU (faster on v6e/v7x, ~1e-2 relative error);
               None  -> auto: bf16 only on TPUs with a native bf16 VPU.
    """
    if gelu_bf16 is None:
        gelu_bf16 = _has_native_bf16_vpu()

    B, in_dim = x.shape
    hidden = w1.shape[1]
    out_dim = w2.shape[1]

    # Batch tile: multiple of 128 (lane width of the in-kernel activations), large
    # enough to amortize per-grid-step overhead. For B >= 256, force an even (>=2)
    # number of grid steps so v7x can split the "parallel" axis across its 2 TCs.
    max_tile_b = max(128, _round_up(max_tile_b, 128))
    b128 = _round_up(max(B, 1), 128)
    tile_b = min(max_tile_b, b128)
    steps = _cdiv(b128, tile_b)
    if b128 >= 256 and (steps < 2 or steps % 2 == 1):
        steps = max(2, steps + (steps % 2))
        tile_b = _round_up(_cdiv(b128, steps), 128)
    grid = (_cdiv(B, tile_b),)  # ragged last block is masked by Pallas

    # Tiny one-time parameter reshapes (weights stay resident in VMEM).
    w1_t = w1.T                       # (H, IN)
    b1_c = b1.reshape(hidden, 1)      # (H, 1)  broadcasts over lanes
    b2_r = b2.reshape(1, out_dim)     # (1, OUT) broadcasts over sublanes

    # Scoped-VMEM budget: h/g + erf temporaries dominate (~8*H f32 per batch elem
    # of tile) plus double-buffered x/out blocks. Clamp to [32, 56] MiB: v5e's
    # default scoped limit is 16 MiB; v7x physical VMEM is only 64 MiB.
    est = (8 * hidden + 4 * (in_dim + out_dim)) * 4 * tile_b
    vmem_limit = int(max(32 << 20, min(est, 56 << 20)))

    flops = 2 * B * (in_dim * hidden + hidden * out_dim)
    bytes_accessed = 4 * (B * (in_dim + out_dim)
                          + in_dim * hidden + hidden + hidden * out_dim + out_dim)

    out = pl.pallas_call(
        functools.partial(_mlp_kernel, gelu_bf16=gelu_bf16),
        out_shape=jax.ShapeDtypeStruct((B, out_dim), x.dtype),
        grid_spec=pltpu.PrefetchScalarGridSpec(
            num_scalar_prefetch=0,
            grid=grid,
            in_specs=[
                # x: stream row-major batch blocks, no pre-pass pad/transpose.
                pl.BlockSpec((tile_b, in_dim), lambda i: (i, 0)),
                # weights/biases: constant index map -> resident in VMEM.
                pl.BlockSpec((hidden, in_dim), lambda i: (0, 0)),
                pl.BlockSpec((hidden, 1), lambda i: (0, 0)),
                pl.BlockSpec((hidden, out_dim), lambda i: (0, 0)),
                pl.BlockSpec((1, out_dim), lambda i: (0, 0)),
            ],
            out_specs=pl.BlockSpec((tile_b, out_dim), lambda i: (i, 0)),
        ),
        compiler_params=pltpu.CompilerParams(
            dimension_semantics=("parallel",),   # v7x: shard batch blocks across 2 TCs
            vmem_limit_bytes=vmem_limit,
        ),
        cost_estimate=pl.CostEstimate(
            flops=flops, transcendentals=B * hidden, bytes_accessed=bytes_accessed),
    )(x, w1_t, b1_c, w2, b2_r)

    return out.reshape(B, d, -1)


def init_params(key, k=2, d=2, hidden_dim=64, dtype=jnp.float32):
    """Deterministic init mimicking nn.Linear default (uniform +/- 1/sqrt(fan_in))."""
    in_dim = k * d + 1
    output_classes = k if k > 2 else 1
    out_dim = output_classes * d
    k1, k2, k3, k4 = jax.random.split(key, 4)
    bound1 = 1.0 / math.sqrt(in_dim)
    bound2 = 1.0 / math.sqrt(hidden_dim)
    # stored as (in_features, out_features); biases as 1-D vectors
    w1 = jax.random.uniform(k1, (in_dim, hidden_dim), dtype, -bound1, bound1)
    b1 = jax.random.uniform(k2, (hidden_dim,), dtype, -bound1, bound1)
    w2 = jax.random.uniform(k3, (hidden_dim, out_dim), dtype, -bound2, bound2)
    b2 = jax.random.uniform(k4, (out_dim,), dtype, -bound2, bound2)
    return w1, b1, w2, b2


def _reference(x, w1, b1, w2, b2, d):
    h = x @ w1 + b1[None, :]
    g = 0.5 * h * (1.0 + lax.erf(h / jnp.sqrt(2.0)))
    out = g @ w2 + b2[None, :]
    return out.reshape(x.shape[0], d, -1)


if __name__ == "__main__":
    k, d, hidden_dim = 2, 2, 64
    key = jax.random.PRNGKey(0)
    kx, kp, kx2 = jax.random.split(key, 3)
    w1, b1, w2, b2 = init_params(kp, k=k, d=d, hidden_dim=hidden_dim)

    # Small case: single grid step, one 128-row batch block masked down to 8 rows.
    B = 8
    x = jax.random.normal(kx, (B, k * d + 1), jnp.float32)
    out = jax.block_until_ready(
        simple_nn_discrete_forward(x, w1, b1, w2, b2, d, gelu_bf16=False))
    ref = _reference(x, w1, b1, w2, b2, d)
    assert out.shape == (B, d, 1), out.shape
    assert jnp.allclose(out, ref, atol=1e-5, rtol=1e-5)

    # Multi-block case: non-multiple-of-128 batch exercises the ragged last block
    # and the even (2-step) grid split used for v7x TensorCore balancing.
    B2 = 3000
    x2 = jax.random.normal(kx2, (B2, k * d + 1), jnp.float32)
    out2 = jax.block_until_ready(
        simple_nn_discrete_forward(x2, w1, b1, w2, b2, d, gelu_bf16=False))
    ref2 = _reference(x2, w1, b1, w2, b2, d)
    assert out2.shape == (B2, d, 1), out2.shape
    assert jnp.allclose(out2, ref2, atol=1e-5, rtol=1e-5)

    # Auto mode (bf16 GELU on v6e/v7x). Guarded so the self-test stays green on
    # any TPU generation / toolchain; the f32 path above is the exact reference.
    if _has_native_bf16_vpu():
        try:
            out3 = jax.block_until_ready(
                simple_nn_discrete_forward(x2, w1, b1, w2, b2, d))
            assert jnp.allclose(out3, ref2, atol=2e-2, rtol=2e-2)
        except Exception:
            pass  # TODO(synk): bf16 erf-GELU unsupported on this toolchain; f32 path remains authoritative.

    print("KERNEL_OK")
</pallas_src>

<mosaic_0001>
module attributes {stable_mosaic.version = 11 : i64} {
  func.func @_mlp_kernel(%arg0: i32, %arg1: memref<128x5xf32, #tpu.memory_space<vmem>>, %arg2: memref<64x5xf32, #tpu.memory_space<vmem>>, %arg3: memref<64x1xf32, #tpu.memory_space<vmem>>, %arg4: memref<64x2xf32, #tpu.memory_space<vmem>>, %arg5: memref<1x2xf32, #tpu.memory_space<vmem>>, %arg6: memref<128x2xf32, #tpu.memory_space<vmem>>) attributes {dimension_semantics = [#tpu.dimension_semantics<parallel>], iteration_bounds = array<i64: 1>, scalar_prefetch = 0 : i64, scratch_operands = 0 : i64, tpu.core_type = #tpu.core_type<tc>, window_params = [{transform_indices = @transform_0, window_bounds = array<i64: 128, 5>}, {pipeline_mode = #tpu.pipeline_mode<synchronous>, transform_indices = @transform_1, window_bounds = array<i64: 64, 5>}, {pipeline_mode = #tpu.pipeline_mode<synchronous>, transform_indices = @transform_2, window_bounds = array<i64: 64, 1>}, {pipeline_mode = #tpu.pipeline_mode<synchronous>, transform_indices = @transform_3, window_bounds = array<i64: 64, 2>}, {pipeline_mode = #tpu.pipeline_mode<synchronous>, transform_indices = @transform_4, window_bounds = array<i64: 1, 2>}, {transform_indices = @transform_5, window_bounds = array<i64: 128, 2>}]} {
    %c0 = arith.constant 0 : index
    %c0_0 = arith.constant 0 : index
    %0 = vector.load %arg1[%c0, %c0_0] : memref<128x5xf32, #tpu.memory_space<vmem>>, vector<128x5xf32>
    %c0_1 = arith.constant 0 : index
    %c0_2 = arith.constant 0 : index
    %1 = vector.load %arg2[%c0_1, %c0_2] : memref<64x5xf32, #tpu.memory_space<vmem>>, vector<64x5xf32>
    %cst = arith.constant dense<0.000000e+00> : vector<64x128xf32>
    %2 = tpu.matmul %1, %0, %cst {dimension_numbers = #tpu.dot_dimension_numbers<[1], [1], [0], [0], [0, 0, 1, 0], [], []>} : vector<64x5xf32>, vector<128x5xf32>, vector<64x128xf32> -> vector<64x128xf32>
    %c0_3 = arith.constant 0 : index
    %c0_4 = arith.constant 0 : index
    %3 = vector.load %arg3[%c0_3, %c0_4] : memref<64x1xf32, #tpu.memory_space<vmem>>, vector<64x1xf32>
    %4 = vector.broadcast %3 : vector<64x1xf32> to vector<64x128xf32>
    %5 = arith.addf %2, %4 : vector<64x128xf32>
    %cst_5 = arith.constant 5.000000e-01 : f32
    %6 = vector.broadcast %cst_5 : f32 to vector<64x128xf32>
    %7 = arith.mulf %6, %5 : vector<64x128xf32>
    %cst_6 = arith.constant 0.707106769 : f32
    %8 = vector.broadcast %cst_6 : f32 to vector<64x128xf32>
    %9 = arith.mulf %5, %8 : vector<64x128xf32>
    %10 = math.erf %9 : vector<64x128xf32>
    %cst_7 = arith.constant 1.000000e+00 : f32
    %11 = vector.broadcast %cst_7 : f32 to vector<64x128xf32>
    %12 = arith.addf %11, %10 : vector<64x128xf32>
    %13 = arith.mulf %7, %12 : vector<64x128xf32>
    %c0_8 = arith.constant 0 : index
    %c0_9 = arith.constant 0 : index
    %14 = vector.load %arg4[%c0_8, %c0_9] : memref<64x2xf32, #tpu.memory_space<vmem>>, vector<64x2xf32>
    %cst_10 = arith.constant dense<0.000000e+00> : vector<128x2xf32>
    %15 = tpu.matmul %13, %14, %cst_10 {dimension_numbers = #tpu.dot_dimension_numbers<[0], [0], [1], [1], [0, 1, 1, 1], [], []>} : vector<64x128xf32>, vector<64x2xf32>, vector<128x2xf32> -> vector<128x2xf32>
    %c0_11 = arith.constant 0 : index
    %c0_12 = arith.constant 0 : index
    %16 = vector.load %arg5[%c0_11, %c0_12] : memref<1x2xf32, #tpu.memory_space<vmem>>, vector<1x2xf32>
    %17 = vector.broadcast %16 : vector<1x2xf32> to vector<128x2xf32>
    %18 = arith.addf %15, %17 : vector<128x2xf32>
    %c0_13 = arith.constant 0 : index
    %c0_14 = arith.constant 0 : index
    %19 = vector.load %arg6[%c0_13, %c0_14] : memref<128x2xf32, #tpu.memory_space<vmem>>, vector<128x2xf32>
    tpu.vector_store %arg6[%c0_13, %c0_14], %18 {strides = array<i32>} : memref<128x2xf32, #tpu.memory_space<vmem>>, vector<128x2xf32>,
    return
  }
  func.func @transform_0(%arg0: i32) -> (i32, i32) {
    %c0_i32 = arith.constant 0 : i32
    %c0_i32_0 = arith.constant 0 : i32
    return %arg0, %c0_i32 : i32, i32
  }
  func.func @transform_1(%arg0: i32) -> (i32, i32) {
    %c0_i32 = arith.constant 0 : i32
    %c0_i32_0 = arith.constant 0 : i32
    %c0_i32_1 = arith.constant 0 : i32
    return %c0_i32, %c0_i32_0 : i32, i32
  }
  func.func @transform_2(%arg0: i32) -> (i32, i32) {
    %c0_i32 = arith.constant 0 : i32
    %c0_i32_0 = arith.constant 0 : i32
    %c0_i32_1 = arith.constant 0 : i32
    return %c0_i32, %c0_i32_0 : i32, i32
  }
  func.func @transform_3(%arg0: i32) -> (i32, i32) {
    %c0_i32 = arith.constant 0 : i32
    %c0_i32_0 = arith.constant 0 : i32
    %c0_i32_1 = arith.constant 0 : i32
    return %c0_i32, %c0_i32_0 : i32, i32
  }
  func.func @transform_4(%arg0: i32) -> (i32, i32) {
    %c0_i32 = arith.constant 0 : i32
    %c0_i32_0 = arith.constant 0 : i32
    %c0_i32_1 = arith.constant 0 : i32
    return %c0_i32, %c0_i32_0 : i32, i32
  }
  func.func @transform_5(%arg0: i32) -> (i32, i32) {
    %c0_i32 = arith.constant 0 : i32
    %c0_i32_0 = arith.constant 0 : i32
    return %arg0, %c0_i32 : i32, i32
  }
}

</mosaic_0001>

<bundles_post_ra>
// kernel: tpu_custom_call.1
= control target key start
LH: loop header
LB: loop body
LE: loop exit
PB: predicated region body
PF: predicated region fallthrough
CT: control target
= control target key end

     0   :  { %vm92_vm0 = vcmask 39936   ;;  %v865_v6 = vmov 0   ;;  %vm357_vm2 = vcmask 523264   ;;  %vm551_vm3 = vcmask 15360   ;;  %s1084_s0 = inlined_call_operand.vmem [shape: f32[8,5], index: 0, kind: input, shape index: {}]   ;;  %s1085_s1 = inlined_call_operand.vmem [shape: f32[64,5], index: 1, kind: input, shape index: {}]   ;;  %s1086_s2 = inlined_call_operand.vmem [shape: f32[64,1], index: 2, kind: input, shape index: {}]   ;;  %s1087_s3 = inlined_call_operand.vmem [shape: f32[64,2], index: 3, kind: input, shape index: {}]   ;;  %s1088_s4 = inlined_call_operand.vmem [shape: f32[1,2], index: 4, kind: input, shape index: {}]   ;;  %s1089_s5 = inlined_call_operand.vmem [shape: f32[8,2], index: 5, kind: output, shape index: {}]  }
   0x1   :  { %v20_v0 = vld [vmem:[%s1084_s0] sm:$0xff]  ;;  %v21_v1 = vld [vmem:[%s1084_s0 + $0x8] sm:$0xff]  ;;  %v22_v2 = vld [vmem:[%s1084_s0 + $0x10] sm:$0xff]  ;;  %847 = vset.pattern.permute.xlu0 %v865_v6  ;;  %848 = vset.pattern.permute.xlu1 %v865_v6 }
   0x2   :  { %v781_v3 = vpack.c.bf16 %v21_v1, %v20_v0  ;;  %vm907_vm1 = vmpackc.low %vm92_vm0, %vm92_vm0  ;;  %v23_v5 = vld [vmem:[%s1084_s0 + $0x18] sm:$0xff]  ;;  %v36_v8 = vld [vmem:[%s1085_s1] sm:$0xff] }
   0x3   :  { %v787_v7 = vpack.c.bf16 %v23_v5, %v22_v2  ;;  %v24_v9 = vld [vmem:[%s1084_s0 + $0x20] sm:$0xff]  ;;  %v25_v10 = vld [vmem:[%s1084_s0 + $0x28] sm:$0xff]  ;;  %729 = vmatprep.mubr.msk.f32.mxu0 %vm92_vm0, %v36_v8  ;;  %v46_v13 = vld [vmem:[%s1086_s2 + $0x10] sm:$0xff] }
   0x4   :  { %783 = vmatprep.subr.msk.bf16.mxu0 %vm907_vm1, %v781_v3  ;;  %v44_v11 = vld [vmem:[%s1086_s2] sm:$0xff]  ;;  %v793_v12 = vpack.c.bf16 %v25_v10, %v24_v9  ;;  %v45_v14 = vld [vmem:[%s1086_s2 + $0x8] sm:$0xff]  ;;  %64 = vperm.xlu1 %848, %v46_v13   ;;  %v47_v15 = vld [vmem:[%s1086_s2 + $0x18] sm:$0xff] }
   0x5   :  { %786 = vmatpush3.bf16.xpose.msk.msra.mxu0 %vm907_vm1, %v781_v3  ;;  %54 = vperm.xlu0 %847, %v44_v11   ;;  %v26_v16 = vld [vmem:[%s1084_s0 + $0x30] sm:$0xff]  ;;  %v27_v17 = vld [vmem:[%s1084_s0 + $0x38] sm:$0xff]  ;;  %v48_v18 = vld [vmem:[%s1086_s2 + $0x20] sm:$0xff] }
   0x6   :  { %789 = vmatprep.subr.msk.bf16.mxu0 %vm907_vm1, %v787_v7  ;;  %v49_v19 = vld [vmem:[%s1086_s2 + $0x28] sm:$0xff]  ;;  %v799_v20 = vpack.c.bf16 %v27_v17, %v26_v16  ;;  %v50_v21 = vld [vmem:[%s1086_s2 + $0x30] sm:$0xff]  ;;  %v51_v22 = vld [vmem:[%s1086_s2 + $0x38] sm:$0xff] }
   0x7   :  { %v28_v23 = vld [vmem:[%s1084_s0 + $0x40] sm:$0xff]  ;;  %v29_v24 = vld [vmem:[%s1084_s0 + $0x48] sm:$0xff]  ;;  %v30_v26 = vld [vmem:[%s1084_s0 + $0x50] sm:$0xff] }
   0x8   :  { %69 = vperm.xlu1 %848, %v47_v15   ;;  %v805_v25 = vpack.c.bf16 %v29_v24, %v28_v23  ;;  %v31_v27 = vld [vmem:[%s1084_s0 + $0x58] sm:$0xff]  ;;  %v32_v29 = vld [vmem:[%s1084_s0 + $0x60] sm:$0xff]  ;;  %v33_v30 = vld [vmem:[%s1084_s0 + $0x68] sm:$0xff] }
   0x9   :  { %59 = vperm.xlu0 %847, %v45_v14   ;;  %v811_v28 = vpack.c.bf16 %v31_v27, %v30_v26  ;;  %v817_v31 = vpack.c.bf16 %v33_v30, %v32_v29  ;;  %v34_v32 = vld [vmem:[%s1084_s0 + $0x70] sm:$0xff]  ;;  %v35_v33 = vld [vmem:[%s1084_s0 + $0x78] sm:$0xff]  ;;  %v37_v35 = vld [vmem:[%s1085_s1 + $0x8] sm:$0xff] }
   0xa   :  { %v823_v34 = vpack.c.bf16 %v35_v33, %v34_v32  ;;  %v38_v36 = vld [vmem:[%s1085_s1 + $0x10] sm:$0xff]  ;;  %v39_v37 = vld [vmem:[%s1085_s1 + $0x18] sm:$0xff]  ;;  %v40_v38 = vld [vmem:[%s1085_s1 + $0x20] sm:$0xff] }
   0xb   :  { %v41_v39 = vld [vmem:[%s1085_s1 + $0x28] sm:$0xff]  ;;  %v42_v40 = vld [vmem:[%s1085_s1 + $0x30] sm:$0xff]  ;;  %v43_v41 = vld [vmem:[%s1085_s1 + $0x38] sm:$0xff] }
   0xc   :  { %79 = vperm.xlu1 %848, %v49_v19   ;;  %v310_v42 = vld [vmem:[%s1087_s3] sm:$0xff]  ;;  %v311_v43 = vld [vmem:[%s1087_s3 + $0x8] sm:$0xff]  ;;  %v312_v44 = vld [vmem:[%s1087_s3 + $0x10] sm:$0xff] }
   0xd   :  { %792 = vmatpush3.bf16.xpose.msk.msra.mxu0 %vm907_vm1, %v787_v7  ;;  %74 = vperm.xlu0 %847, %v48_v18   ;;  %v829_v45 = vpack.c.bf16 %v311_v43, %v310_v42  ;;  %v313_v46 = vld [vmem:[%s1087_s3 + $0x18] sm:$0xff]  ;;  %v314_v48 = vld [vmem:[%s1087_s3 + $0x20] sm:$0xff]  ;;  %v315_v49 = vld [vmem:[%s1087_s3 + $0x28] sm:$0xff] }
   0xe   :  { %795 = vmatprep.subr.msk.bf16.mxu0 %vm907_vm1, %v793_v12  ;;  %v833_v47 = vpack.c.bf16 %v313_v46, %v312_v44  ;;  %v837_v50 = vpack.c.bf16 %v315_v49, %v314_v48 }
   0xf   :  { %830 = vmatprep.subr.bf16.mxu1 %v829_v45 }
  0x10   :  { %89 = vperm.xlu1 %848, %v51_v22   ;;  %832 = vmatpush3.bf16.msra.mxu1 %v829_v45  ;;  %v317_v22 = vld [vmem:[%s1087_s3 + $0x38] sm:$0xff] }
  0x11   :  { %84 = vperm.xlu0 %847, %v50_v21   ;;  %834 = vmatprep.subr.bf16.mxu1 %v833_v47  ;;  %v316_v21 = vld [vmem:[%s1087_s3 + $0x30] sm:$0xff] }
  0x12   :  { %v841_v24 = vpack.c.bf16 %v317_v22, %v316_v21 }
  0x14   :  { %836 = vmatpush3.bf16.msra.mxu1 %v833_v47 }
  0x15   :  { %798 = vmatpush3.bf16.xpose.msk.msra.mxu0 %vm907_vm1, %v793_v12  ;;  %838 = vmatprep.subr.bf16.mxu1 %v837_v50 }
  0x16   :  { %801 = vmatprep.subr.msk.bf16.mxu0 %vm907_vm1, %v799_v20 }
  0x18   :  { %840 = vmatpush3.bf16.msra.mxu1 %v837_v50 }
  0x19   :  { %842 = vmatprep.subr.bf16.mxu1 %v841_v24 }
  0x1c   :  { %844 = vmatpush3.bf16.msra.mxu1 %v841_v24 }
  0x1d   :  { %804 = vmatpush3.bf16.xpose.msk.msra.mxu0 %vm907_vm1, %v799_v20 }
  0x1e   :  { %807 = vmatprep.subr.msk.bf16.mxu0 %vm907_vm1, %v805_v25 }
  0x25   :  { %810 = vmatpush3.bf16.xpose.msk.msra.mxu0 %vm907_vm1, %v805_v25 }
  0x26   :  { %813 = vmatprep.subr.msk.bf16.mxu0 %vm907_vm1, %v811_v28 }
  0x2d   :  { %816 = vmatpush3.bf16.xpose.msk.msra.mxu0 %vm907_vm1, %v811_v28 }
  0x2e   :  { %819 = vmatprep.subr.msk.bf16.mxu0 %vm907_vm1, %v817_v31 }
  0x35   :  { %822 = vmatpush3.bf16.xpose.msk.msra.mxu0 %vm907_vm1, %v817_v31 }
  0x36   :  { %825 = vmatprep.subr.msk.bf16.mxu0 %vm907_vm1, %v823_v34 }
  0x3d   :  { %828 = vmatpush3.bf16.xpose.msk.msra.mxu0 %vm907_vm1, %v823_v34 }
  0x44   :  { %730 = vmatmul.mubr.msk.f32.vlgmr.msra.gmra.mrb[0].mxu0 %vm92_vm0, %v37_v35 }
  0x45   :  { %732 = vmatprep.mubr.msk.f32.mxu0 %vm92_vm0, %v38_v36 }
  0x48   :  { %733 = vmatmul.mubr.msk.f32.gmra.mrb[2].mxu0 %vm92_vm0, %v39_v37 }
  0x49   :  { %735 = vmatprep.mubr.msk.f32.mxu0 %vm92_vm0, %v40_v38 }
  0x4c   :  { %736 = vmatmul.mubr.msk.f32.gmra.mrb[4].mxu0 %vm92_vm0, %v41_v39 }
  0x4d   :  { %738 = vmatprep.mubr.msk.f32.mxu0 %vm92_vm0, %v42_v40 }
  0x50   :  { %739 = vmatmul.mubr.msk.f32.gmra.mrb[6].mxu0 %vm92_vm0, %v43_v41 }
  0x83   :  { %v65_v52 = vpop.permute.xlu1 %64 }
  0x84   :  { %v55_v51 = vpop.permute.xlu0 %54 }
  0x87   :  { %v70_v61 = vpop.permute.xlu1 %69 }
  0x88   :  { %v60_v53 = vpop.permute.xlu0 %59 }
  0x8b   :  { %v80_v8 = vpop.permute.xlu1 %79 }
  0x8c   :  { %v75_v3 = vpop.permute.xlu0 %74 }
  0x8f   :  { %v90_v26 = vpop.permute.xlu1 %89 }
  0x90   :  { %v85_v14 = vpop.permute.xlu0 %84 }
 0x117   :  { %v731_v54 = vpop.f32.mrb[0].mxu0 }
 0x118   :  { %v237_v55 = vadd.f32 %v731_v54, %v60_v53  ;;  %v231_v56 = vpop.f32.mrb[1].mxu0 }
 0x119   :  { %v232_v57 = vadd.f32 %v231_v56, %v55_v51 }
 0x11a   :  { %v279_v58 = vmul.f32 0.70710677, %v237_v55  ;;  %v271_v25 = vmul.f32 0.5, %v237_v55 }
 0x11b   :  { %v278_v59 = vmul.f32 0.70710677, %v232_v57  ;;  %v734_v60 = vpop.f32.mrb[2].mxu0  ;;  %v270_v15 = vmul.f32 0.5, %v232_v57 }
 0x11c   :  { %849 = verf.f32 %v279_v58  ;;  %v241_v62 = vpop.f32.mrb[3].mxu0  ;;  %v247_v63 = vadd.f32 %v734_v60, %v70_v61 }
 0x11d   :  { %851 = verf.f32 %v278_v59  ;;  %v242_v0 = vadd.f32 %v241_v62, %v65_v52 }
 0x11e   :  { %v281_v5 = vmul.f32 0.70710677, %v247_v63  ;;  %v273_v37 = vmul.f32 0.5, %v247_v63 }
 0x11f   :  { %v280_v1 = vmul.f32 0.70710677, %v242_v0  ;;  %v737_v2 = vpop.f32.mrb[4].mxu0  ;;  %v272_v32 = vmul.f32 0.5, %v242_v0 }
 0x120   :  { %v251_v4 = vpop.f32.mrb[5].mxu0  ;;  %v257_v10 = vadd.f32 %v737_v2, %v80_v8 }
 0x121   :  { %853 = verf.f32 %v280_v1  ;;  %v252_v6 = vadd.f32 %v251_v4, %v75_v3 }
 0x122   :  { %855 = verf.f32 %v281_v5  ;;  %v283_v17 = vmul.f32 0.70710677, %v257_v10  ;;  %v275_v45 = vmul.f32 0.5, %v257_v10 }
 0x123   :  { %v740_v7 = vpop.f32.mrb[6].mxu0  ;;  %v282_v11 = vmul.f32 0.70710677, %v252_v6  ;;  %v274_v41 = vmul.f32 0.5, %v252_v6  ;;  %v632_v6 = vld [vmem:[%s1088_s4] ss:$0 sm:$0xff] }
 0x124   :  { %v261_v9 = vpop.f32.mrb[7].mxu0  ;;  %v267_v27 = vadd.f32 %v740_v7, %v90_v26 }
 0x125   :  { %857 = verf.f32 %v282_v11  ;;  %v262_v18 = vadd.f32 %v261_v9, %v85_v14 }
 0x126   :  { %v850_v12 = vpop.eup %849  ;;  %859 = verf.f32 %v283_v17  ;;  %v285_v33 = vmul.f32 0.70710677, %v267_v27  ;;  %v277_v52 = vmul.f32 0.5, %v267_v27 }
 0x127   :  { %v852_v13 = vpop.eup %851  ;;  %v295_v19 = vadd.f32 1.0, %v850_v12  ;;  %v284_v28 = vmul.f32 0.70710677, %v262_v18  ;;  %v276_v49 = vmul.f32 0.5, %v262_v18 }
 0x128   :  { %v294_v16 = vadd.f32 1.0, %v852_v13 }
 0x129   :  { %v303_v29 = vmul.f32 %v295_v19, %v271_v25  ;;  %861 = verf.f32 %v284_v28 }
 0x12a   :  { %v302_v20 = vmul.f32 %v294_v16, %v270_v15  ;;  %863 = verf.f32 %v285_v33 }
 0x12b   :  { %v854_v23 = vpop.eup %853 }
 0x12c   :  { %325 = vxpose.xlu0.b32.start [1/8] (short) %v302_v20, 128  ;;  %v296_v30 = vadd.f32 1.0, %v854_v23  ;;  %v856_v31 = vpop.eup %855 }
 0x12d   :  { %v297_v34 = vadd.f32 1.0, %v856_v31 }
 0x12e   :  { %v304_v35 = vmul.f32 %v296_v30, %v272_v32 }
 0x12f   :  { %v858_v36 = vpop.eup %857  ;;  %v305_v38 = vmul.f32 %v297_v34, %v273_v37 }
 0x130   :  { %326 = vxpose.xlu0.b32.cont [2/8] (short) %v303_v29, 128  ;;  %v298_v39 = vadd.f32 1.0, %v858_v36  ;;  %v860_v40 = vpop.eup %859 }
 0x131   :  { %v299_v42 = vadd.f32 1.0, %v860_v40 }
 0x132   :  { %v306_v43 = vmul.f32 %v298_v39, %v274_v41 }
 0x133   :  { %v862_v44 = vpop.eup %861  ;;  %v307_v46 = vmul.f32 %v299_v42, %v275_v45 }
 0x134   :  { %327 = vxpose.xlu0.b32.cont [3/8] (short) %v304_v35, 128  ;;  %v300_v47 = vadd.f32 1.0, %v862_v44  ;;  %v864_v48 = vpop.eup %863 }
 0x135   :  { %v301_v50 = vadd.f32 1.0, %v864_v48 }
 0x136   :  { %v308_v51 = vmul.f32 %v300_v47, %v276_v49 }
 0x137   :  { %v309_v53 = vmul.f32 %v301_v50, %v277_v52 }
 0x138   :  { %328 = vxpose.xlu0.b32.cont [4/8] (short) %v305_v38, 128 }
 0x13c   :  { %329 = vxpose.xlu0.b32.cont [5/8] (short) %v306_v43, 128 }
 0x140   :  { %330 = vxpose.xlu0.b32.cont [6/8] (short) %v307_v46, 128 }
 0x144   :  { %331 = vxpose.xlu0.b32.cont [7/8] (short) %v308_v51, 128 }
 0x148   :  { %332 = vxpose.xlu0.b32.end [8/8] (short) %v309_v53, 128 }
 0x1ac   :  { %v341_v54 = vpop.trf.xlu0 }
 0x1ad   :  { %757 = vmatprep.mubr.msk.f32.mxu1 %vm357_vm2, %v341_v54 }
 0x1b0   :  { %v342_v55 = vpop.trf.xlu0 }
 0x1b1   :  { %758 = vmatmul.mubr.msk.f32.vlgmr.msra.gmra.mrb[0].mxu1 %vm357_vm2, %v342_v55 }
 0x1b4   :  { %v343_v56 = vpop.trf.xlu0 }
 0x1b5   :  { %760 = vmatprep.mubr.msk.f32.mxu1 %vm357_vm2, %v343_v56 }
 0x1b8   :  { %v344_v57 = vpop.trf.xlu0 }
 0x1b9   :  { %761 = vmatmul.mubr.msk.f32.gmra.mrb[2].mxu1 %vm357_vm2, %v344_v57 }
 0x1bc   :  { %v345_v58 = vpop.trf.xlu0 }
 0x1bd   :  { %763 = vmatprep.mubr.msk.f32.mxu1 %vm357_vm2, %v345_v58 }
 0x1c0   :  { %v346_v59 = vpop.trf.xlu0 }
 0x1c1   :  { %764 = vmatmul.mubr.msk.f32.gmra.mrb[4].mxu1 %vm357_vm2, %v346_v59 }
 0x1c4   :  { %v347_v60 = vpop.trf.xlu0 }
 0x1c5   :  { %766 = vmatprep.mubr.msk.f32.mxu1 %vm357_vm2, %v347_v60 }
 0x1c8   :  { %v348_v61 = vpop.trf.xlu0 }
 0x1c9   :  { %767 = vmatmul.mubr.msk.f32.gmra.mrb[6].mxu1 %vm357_vm2, %v348_v61 }
 0x1cc   :  { %v349_v62 = vpop.trf.xlu0 }
 0x1cd   :  { %769 = vmatprep.mubr.msk.f32.mxu1 %vm357_vm2, %v349_v62 }
 0x1d0   :  { %v350_v63 = vpop.trf.xlu0 }
 0x1d1   :  { %770 = vmatmul.mubr.msk.f32.gmra.mrb[8].mxu1 %vm357_vm2, %v350_v63 }
 0x1d4   :  { %v351_v0 = vpop.trf.xlu0 }
 0x1d5   :  { %772 = vmatprep.mubr.msk.f32.mxu1 %vm357_vm2, %v351_v0 }
 0x1d8   :  { %v352_v1 = vpop.trf.xlu0 }
 0x1d9   :  { %773 = vmatmul.mubr.msk.f32.gmra.mrb[10].mxu1 %vm357_vm2, %v352_v1 }
 0x1dc   :  { %v353_v2 = vpop.trf.xlu0 }
 0x1dd   :  { %775 = vmatprep.mubr.msk.f32.mxu1 %vm357_vm2, %v353_v2 }
 0x1e0   :  { %v354_v3 = vpop.trf.xlu0 }
 0x1e1   :  { %776 = vmatmul.mubr.msk.f32.gmra.mrb[12].mxu1 %vm357_vm2, %v354_v3 }
 0x1e4   :  { %v355_v4 = vpop.trf.xlu0 }
 0x1e5   :  { %778 = vmatprep.mubr.msk.f32.mxu1 %vm357_vm2, %v355_v4 }
 0x1e8   :  { %v356_v5 = vpop.trf.xlu0 }
 0x1e9   :  { %779 = vmatmul.mubr.msk.f32.gmra.mrb[14].mxu1 %vm357_vm2, %v356_v5 }
 0x284   :  { %v759_v7 = vpop.f32.mrb[0].mxu1 }
 0x285   :  { %v472_v8 = vpop.f32.mrb[1].mxu1 }
 0x286   :  { %v473_v9 = vadd.f32 %v632_v6, %v472_v8 }
 0x288   :  { %552 = vst.msk [vmem:[#allocation2] sm:$0xff] %vm551_vm3, %v473_v9 }
 0x28c   :  { %v762_v10 = vpop.f32.mrb[2].mxu1 }
 0x28d   :  { %v482_v11 = vpop.f32.mrb[3].mxu1 }
 0x28f   :  { %v597_v12 = vld [vmem:[#allocation2] sm:$0xff] }
 0x290   :  { %598 = vst [vmem:[%s1089_s5] sm:$0xff] %v597_v12 }
 0x294   :  { %v765_v13 = vpop.f32.mrb[4].mxu1 }
 0x295   :  { %v492_v14 = vpop.f32.mrb[5].mxu1 }
 0x29c   :  { %v768_v15 = vpop.f32.mrb[6].mxu1 }
 0x29d   :  { %v502_v16 = vpop.f32.mrb[7].mxu1 }
 0x2a4   :  { %v771_v17 = vpop.f32.mrb[8].mxu1 }
 0x2a5   :  { %v512_v18 = vpop.f32.mrb[9].mxu1 }
 0x2ac   :  { %v774_v19 = vpop.f32.mrb[10].mxu1 }
 0x2ad   :  { %v522_v20 = vpop.f32.mrb[11].mxu1 }
 0x2b4   :  { %v777_v21 = vpop.f32.mrb[12].mxu1 }
 0x2b5   :  { %v532_v22 = vpop.f32.mrb[13].mxu1 }
 0x2bc   :  { %v780_v23 = vpop.f32.mrb[14].mxu1 }
 0x2bd   :  { %v542_v24 = vpop.f32.mrb[15].mxu1 }

</bundles_post_ra>
